<compile_context>
chip_gen: v6e
topology: v6e:2x2x1
jax: 0.10.0
libtpu: 0.0.40
codegen_flags: <defaults>
</compile_context>

<pallas_src>
import functools

import jax
import jax.numpy as jnp
from jax.experimental import pallas as pl
from jax.experimental.pallas import tpu as pltpu


def _joint_binomial_kernel(x_ref, w_ref, o_ref, *, inv_temp):
    # x_ref: [TN, D]  tile of inputs (last tile may contain undefined rows
    #                 past N; they only affect discarded output columns)
    # w_ref: [8, D]   fixed-effect weight, row-replicated (resident in VMEM)
    # o_ref: [1, TN]  lane-dense output tile of clipped logits
    x = x_ref[...]
    w = w_ref[...]
    # s[r, n] = sum_d w[r, d] * x[n, d]  == w @ x.T  (q@k^T MXU pattern).
    # Row index of the result lands on lanes -> lane-dense store.
    s = jax.lax.dot_general(
        w, x,
        dimension_numbers=(((1,), (1,)), ((), ())),
        preferred_element_type=jnp.float32,
    )                                                   # [8, TN] f32
    logits = jnp.clip(s[0:1, :] * inv_temp, -6.0, 6.0)  # [1, TN]
    o_ref[...] = logits.astype(o_ref.dtype)


def joint_binomial_forward(X, W_weight, temp, *, tile_n=8192, use_bf16=False):
    """X: [N, D] f32, W_weight: [1, D] f32 (nn.Linear(D,1,bias=False).weight),
    temp: python float.  Returns [N] f32 logits clipped to [-6, 6]."""
    N, D = X.shape
    assert W_weight.shape == (1, D)

    # Replicate the (1, D) weight to 8 sublanes so the resident block is
    # natively sublane-tileable; only row 0 of the matmul result is used.
    w8 = jnp.tile(W_weight.reshape(1, D), (8, 1))

    if use_bf16:
        # Halves HBM bytes of the only large stream; MXU accumulates in f32.
        X = X.astype(jnp.bfloat16)
        w8 = w8.astype(jnp.bfloat16)

    itemsize = jnp.dtype(X.dtype).itemsize

    # --- Row-tile selection ---------------------------------------------
    # Multiple of 128 (lane-dense out block), capped by a ~4 MiB per-buffer
    # VMEM budget (double-buffered -> ~8 MiB, safe under v5e's 16 MiB scoped
    # default), and no wider than the 128-padded problem.
    tile_n = max(128, ((int(tile_n) + 127) // 128) * 128)
    vmem_budget_per_buf = 4 * 1024 * 1024
    max_tile_by_vmem = max(128, (vmem_budget_per_buf // (D * itemsize)) // 128 * 128)
    tile_n = min(tile_n, max_tile_by_vmem)

    n_pad_all = pl.cdiv(N, 128) * 128
    tile_n = min(tile_n, n_pad_all)
    # Keep at least two grid steps when N allows, so both TensorCores on
    # megacore parts (v7x) get work.
    if pl.cdiv(n_pad_all, tile_n) < 2 and n_pad_all >= 256:
        tile_n = max(128, pl.cdiv(n_pad_all // 2, 128) * 128)

    num_tiles = pl.cdiv(N, tile_n)
    n_pad = num_tiles * tile_n  # only the (tiny) OUTPUT is over-allocated

    kernel = functools.partial(_joint_binomial_kernel, inv_temp=1.0 / float(temp))

    cost = pl.CostEstimate(
        flops=2 * N * D,
        transcendentals=0,
        bytes_accessed=N * D * itemsize + 8 * D * itemsize + N * 4,
    )

    out = pl.pallas_call(
        kernel,
        out_shape=jax.ShapeDtypeStruct((1, n_pad), jnp.float32),
        grid_spec=pltpu.PrefetchScalarGridSpec(
            num_scalar_prefetch=0,
            grid=(num_tiles,),
            in_specs=[
                # X row tile; last (ragged) block reads past N -> undefined
                # rows that only touch discarded output columns.
                pl.BlockSpec((tile_n, D), lambda i: (i, 0)),
                pl.BlockSpec((8, D), lambda i: (0, 0)),       # resident weight
            ],
            out_specs=pl.BlockSpec((1, tile_n), lambda i: (0, i)),  # lane-dense
        ),
        compiler_params=pltpu.CompilerParams(
            dimension_semantics=("parallel",)),
        cost_estimate=cost,
    )(X, w8)
    return out[0, :N]


def reference_forward(X, W_weight, temp):
    # Pure-JAX reference mirroring the PyTorch forward.
    return jnp.clip((1.0 / temp) * (X @ W_weight.T)[:, 0], -6.0, 6.0)


if __name__ == "__main__":
    key = jax.random.PRNGKey(0)
    N, D = 1024, 128            # rows, num_inputs (small, tile-friendly)
    temp = 2.0
    alpha = 0.1                 # regularization coefficient; unused in forward

    k_x, k_w = jax.random.split(key)
    X = jax.random.normal(k_x, (N, D), dtype=jnp.float32)
    # nn.Linear(D, 1, bias=False) default init bound.
    bound = 1.0 / (D ** 0.5)
    W_weight = jax.random.uniform(k_w, (1, D), minval=-bound, maxval=bound,
                                  dtype=jnp.float32)

    out = joint_binomial_forward(X, W_weight, temp)
    out = jax.block_until_ready(out)

    ref = reference_forward(X, W_weight, temp)
    assert out.shape == (N,)
    assert jnp.allclose(out, ref, atol=1e-4, rtol=1e-4), "mismatch vs reference"

    # Ragged-N path: cdiv grid over the UNPADDED X (no jnp.pad); the last
    # block's out-of-bounds rows only produce garbage in sliced-off columns.
    for N2 in (200, 2000):
        k2 = jax.random.fold_in(key, N2)
        X2 = jax.random.normal(k2, (N2, D), dtype=jnp.float32)
        out2 = jax.block_until_ready(joint_binomial_forward(X2, W_weight, temp))
        ref2 = reference_forward(X2, W_weight, temp)
        assert out2.shape == (N2,)
        assert jnp.allclose(out2, ref2, atol=1e-4, rtol=1e-4), \
            f"mismatch (ragged N={N2})"

    # Optional bf16-input streaming path (f32 accumulation); looser tolerance.
    out_bf16 = jax.block_until_ready(
        joint_binomial_forward(X, W_weight, temp, use_bf16=True))
    assert out_bf16.shape == (N,)
    assert jnp.allclose(out_bf16, ref, atol=5e-2, rtol=5e-2), "mismatch (bf16)"

    print("KERNEL_OK")
</pallas_src>

<mosaic_0001>
module attributes {stable_mosaic.version = 11 : i64} {
  func.func @_joint_binomial_kernel(%arg0: i32, %arg1: memref<512x128xf32, #tpu.memory_space<vmem>>, %arg2: memref<8x128xf32, #tpu.memory_space<vmem>>, %arg3: memref<1x512xf32, #tpu.memory_space<vmem>>) attributes {dimension_semantics = [#tpu.dimension_semantics<parallel>], iteration_bounds = array<i64: 2>, scalar_prefetch = 0 : i64, scratch_operands = 0 : i64, tpu.core_type = #tpu.core_type<tc>, window_params = [{transform_indices = @transform_0, window_bounds = array<i64: 512, 128>}, {pipeline_mode = #tpu.pipeline_mode<synchronous>, transform_indices = @transform_1, window_bounds = array<i64: 8, 128>}, {transform_indices = @transform_2, window_bounds = array<i64: 1, 512>}]} {
    %c0 = arith.constant 0 : index
    %c0_0 = arith.constant 0 : index
    %0 = vector.load %arg1[%c0, %c0_0] : memref<512x128xf32, #tpu.memory_space<vmem>>, vector<512x128xf32>
    %c0_1 = arith.constant 0 : index
    %c0_2 = arith.constant 0 : index
    %1 = vector.load %arg2[%c0_1, %c0_2] : memref<8x128xf32, #tpu.memory_space<vmem>>, vector<8x128xf32>
    %cst = arith.constant dense<0.000000e+00> : vector<8x512xf32>
    %2 = tpu.matmul %1, %0, %cst {dimension_numbers = #tpu.dot_dimension_numbers<[1], [1], [0], [0], [0, 0, 1, 0], [], []>} : vector<8x128xf32>, vector<512x128xf32>, vector<8x512xf32> -> vector<8x512xf32>
    %3 = vector.extract_strided_slice %2 {offsets = [0, 0], sizes = [1, 512], strides = [1, 1]} : vector<8x512xf32> to vector<1x512xf32>
    %cst_3 = arith.constant 5.000000e-01 : f32
    %4 = vector.broadcast %cst_3 : f32 to vector<1x512xf32>
    %5 = arith.mulf %3, %4 : vector<1x512xf32>
    %cst_4 = arith.constant -6.000000e+00 : f32
    %cst_5 = arith.constant 6.000000e+00 : f32
    %6 = vector.broadcast %cst_4 : f32 to vector<1x512xf32>
    %7 = arith.maximumf %6, %5 : vector<1x512xf32>
    %8 = vector.broadcast %cst_5 : f32 to vector<1x512xf32>
    %9 = arith.minimumf %8, %7 : vector<1x512xf32>
    %c0_6 = arith.constant 0 : index
    %c0_7 = arith.constant 0 : index
    %10 = vector.load %arg3[%c0_6, %c0_7] : memref<1x512xf32, #tpu.memory_space<vmem>>, vector<1x512xf32>
    tpu.vector_store %arg3[%c0_6, %c0_7], %9 {strides = array<i32>} : memref<1x512xf32, #tpu.memory_space<vmem>>, vector<1x512xf32>,
    return
  }
  func.func @transform_0(%arg0: i32) -> (i32, i32) {
    %c0_i32 = arith.constant 0 : i32
    %c0_i32_0 = arith.constant 0 : i32
    return %arg0, %c0_i32 : i32, i32
  }
  func.func @transform_1(%arg0: i32) -> (i32, i32) {
    %c0_i32 = arith.constant 0 : i32
    %c0_i32_0 = arith.constant 0 : i32
    %c0_i32_1 = arith.constant 0 : i32
    return %c0_i32, %c0_i32_0 : i32, i32
  }
  func.func @transform_2(%arg0: i32) -> (i32, i32) {
    %c0_i32 = arith.constant 0 : i32
    %c0_i32_0 = arith.constant 0 : i32
    return %c0_i32, %arg0 : i32, i32
  }
}

</mosaic_0001>

<bundles_post_ra>
// kernel: tpu_custom_call.1
= control target key start
LH: loop header
LB: loop body
LE: loop exit
PB: predicated region body
PF: predicated region fallthrough
CT: control target
= control target key end

     0   :  { %7 = vsyncpa [#allocation3], 0  ;;  %s1060_s0 = inlined_call_operand.hbm [shape: f32[1024,128], index: 0, kind: input, shape index: {}]   ;;  %s1061_s1 = inlined_call_operand.hbm [shape: f32[8,128], index: 1, kind: input, shape index: {}]   ;;  %s1062_s2 = inlined_call_operand.hbm [shape: f32[1,1024], index: 2, kind: output, shape index: {}]  }
   0x1   :  { %9 = vsyncpa [#allocation3 + $0x1], 0 }
   0x2   :  { %10 = vsyncpa [#allocation6], 0 }
   0x3   :  { %11 = vsyncpa [#allocation4], 0 }
   0x4   :  { %13 = vsyncpa [#allocation4 + $0x1], 0  ;;  %s820_s9 = smov 0   ;;  %s822_s10 = smov 0  }
   0x5   :  { %s824_s11 = smov 0   ;;  %s826_s12 = smov 0  }
   0x6 LB: > { %s841_s13 = sadd.s32 4294967295, %s797_s12   ;;  %s525_s14 = sadd.s32 4294967294, %s797_s12   ;;  %s797_s12 = sphi %s826_s12, %s1085_s12   ;;  %s793_s11 = sphi %s824_s11, %s1084_s11   ;;  %s789_s10 = sphi %s822_s10, %s1083_s10   ;;  %s785_s9 = sphi %s820_s9, %s1082_s9  }
   0x7   : > { %s845_s15 = sadd.s32 1, %s797_s12   ;;  %s26_s16 = sadd.s32 1, %s793_s11 }
   0x8   : > { %s23_s17 = ssub.s32 %s797_s12, %s845_s15  ;;  %p33_p0 = scmp.ne.s32.totalorder %s793_s11, %s789_s10 }
   0x9   : > { %p24_p1 = scmp.eq.s32.totalorder %s23_s17, 0  ;;  %p34_p2 = scmp.eq.s32.totalorder %s797_s12, 0 }
   0xa   : > { %p39_p3 = scmp.ne.s32.totalorder %s789_s10, %s785_s9  ;;  %p1063_p4 = scmp.eq.s32.totalorder %s841_s13, 0 }
   0xb   : > { %s857_s18 = scalar_select %p24_p1, %s793_s11, %s26_s16  }
   0xc   : > { %p859_p5 = por %p34_p2, %p33_p0  ;;  %p865_p6 = por %p1063_p4, %p39_p3 }
   0xd   : > { %p84_p7 = scmp.eq.s32.totalorder %s841_s13, 1  ;;  %p90_p8 = scmp.eq.s32.totalorder %s525_s14, 1 }
   0xe   : > { %s1068_s20 = scalar_select %p865_p6, 1, 0 }
   0xf   : > { %p526_p9 = scmp.ge.s32.totalorder %s797_s12, 1  ;;  %p97_p10 = scmp.lt.s32.totalorder %s797_s12, 3 }
  0x10   : > { %p872_p11 = por %p84_p7, %p33_p0  ;;  %p876_p12 = por %p90_p8, %p39_p3 }
  0x11   : > { %p880_p13 = pnand %p526_p9, %p97_p10  ;;  %s799_s24 = smov [#allocation5]  }
  0x12   : > { %s1069_s21 = scalar_select %p872_p11, 1, 0 }
  0x13   : > { %s1070_s22 = scalar_select %p876_p12, 1, 0 }
  0x14   : > { %s1071_s23 = scalar_select %p880_p13, 1, 0 }
  0x15   : > { %p623_p2 = pneg %p880_p13  ;;  %s110_s25 = sshll.u32 %s799_s24, 4  ;;  %s111_s25 = int_to_ptr.vmem [resolvable:$true] %s110_s25 }
  0x16   : > { %p636_p4 = scmp.lt.s32.totalorder %s797_s12, 2  ;;  %p1072_p0 = scmp.eq.s32.totalorder %s841_s13, 0 }
  0x17   : > { %s121_s27 = sand.u32 1, %s793_s11   ;;  %s686_s30 = scalar_lea.vmem %s111_s25, 128 }
  0x18   : > { %p890_p7 = pnand %p623_p2, %p1072_p0  ;;  %p897_p3 = pnand %p636_p4, %p859_p5 }
  0x19   : > { %s529_s29 = sshll.u32 %s121_s27, 9  ;;  %p687_p9 = scmp.ne.s32.totalorder %s111_s25, %s686_s30 }
  0x1a   : > { %p677_p8 = pneg %p890_p7  ;;  %p694_p12 = scmp.lt.s32.totalorder %s111_s25, %s111_s25 }
  0x1b   : > { %p695_p11 = scmp.lt.s32.totalorder %s686_s30, %s686_s30 }
  0x1c   : > { %p689_p10 = pnand %p687_p9, %p677_p8 }
  0x1d   : > { %p696_p2 = por %p695_p11, %p694_p12 }
  0x1e   : > { %p690_p1 = pneg %p689_p10 }
  0x20   : > { %p697_p0 = pnand %p696_p2, %p690_p1 }
  0x22   : > { %700 = shalt.err (!%p697_p0)
}
  0x23   : > { %626 = dma.hbm_to_vmem [thread:$0]  (!%p890_p7), %s1061_s1, 128, %s111_s25, [#allocation6]  }
  0x24   : > { %s545_s5 = sshll.u32 %s797_s12, 13  ;;  %s125_s6 = scalar_lea.vmem [#allocation2], %s529_s29 }
  0x25   : > { %s132_s7 = sshll.u32 %s125_s6, 4  ;;  %s912_s16 = scalar_lea.hbm %s1060_s0, %s545_s5  ;;  %s914_s7 = int_to_ptr.vmem [resolvable:$true] %s132_s7 }
  0x26   : > { %s916_s17 = scalar_lea.sflag [#allocation3], %s121_s27  ;;  %s701_s19 = scalar_lea.hbm %s912_s16, 8192 }
  0x27   : > { %p702_p4 = scmp.ne.s32.totalorder %s912_s16, %s701_s19  ;;  %p703_p5 = pneg %p897_p3 }
  0x28   : > { %s706_s26 = scalar_lea.hbm %s1060_s0, 16384  ;;  %p707_p1 = scmp.lt.s32.totalorder %s912_s16, %s1060_s0 }
  0x29   : > { %p704_p11 = pnand %p703_p5, %p702_p4  ;;  %p708_p7 = scmp.lt.s32.totalorder %s706_s26, %s701_s19 }
  0x2b   : > { %p705_p12 = pneg %p704_p11  ;;  %p709_p8 = por %p708_p7, %p707_p1 }
  0x2d   : > { %p710_p9 = pnand %p709_p8, %p705_p12 }
  0x2f   : > { %713 = shalt.err (!%p710_p9)
}
  0x30   : > { %s714_s27 = scalar_lea.vmem %s914_s7, 8192  ;;  %s800_s3 = smov [#allocation2]  }
  0x31   : > { %p715_p10 = scmp.ne.s32.totalorder %s914_s7, %s714_s27  ;;  %s719_s4 = sshll.u32 %s800_s3, 4  ;;  %s720_s4 = int_to_ptr.vmem [resolvable:$false] %s719_s4 }
  0x32   : > { %s721_s5 = scalar_lea.vmem %s720_s4, 16384  ;;  %p722_p4 = scmp.lt.s32.totalorder %s914_s7, %s720_s4 }
  0x33   : > { %p717_p2 = pnand %p715_p10, %p703_p5  ;;  %p723_p11 = scmp.lt.s32.totalorder %s721_s5, %s714_s27 }
  0x35   : > { %p718_p0 = pneg %p717_p2  ;;  %p724_p6 = por %p723_p11, %p722_p4 }
  0x37   : > { %p725_p13 = pnand %p724_p6, %p718_p0 }
  0x39   : > { %728 = shalt.err (!%p725_p13)
}
  0x3a   : > { %s801_s6 = smov 128   ;;  %s802_s8 = smov 8  }
  0x3b   : > { %630 = dma.hbm_to_vmem [thread:$0]  (!%p897_p3), %s912_s16, 8192, %s914_s7, %s916_s17, %s801_s6, %s801_s6, %s802_s8  }
  0x3c   : > { %p1075_p5 = scmp.ne.s32.totalorder %s1071_s23, 0 }
  0x3d   : > { %s940_s14 = sand.u32 (!%p1075_p5), 1, %s789_s10   ;;  %p1076_p6 = scmp.ne.s32.totalorder (!%p1075_p5), %s1068_s20, 0 }
  0x3e   : > { %144 = sbr.rel (%p1075_p5) target bundleno = 358 (0x166), region = 28  ;;  %s533_s19 = sshll.u32 (!%p1075_p5), %s940_s14, 9 }
  0x3f   : > { %s147_s24 = scalar_lea.sflag (!%p1075_p5), [#allocation3], %s940_s14  ;;  %s944_s25 = scalar_lea.vmem (!%p1075_p5), [#allocation2], %s533_s19 }
  0x43   : > { %772 = dma.done.wait (%p1076_p6), %s147_s24, 8192  }
  0x44   : > { %774 = vsyncadd (%p1076_p6), %s147_s24, 4294959104  ;;  %p1077_p13 = scmp.eq.s32.totalorder %s841_s13, 0 }
  0x46   : > { %776 = dma.done.wait (%p1077_p13), [#allocation6], 128   ;;  %p1078_p3 = pmov %p1077_p13 }
  0x47   : > { %v208_v0 = vld [vmem:[%s944_s25 + $0xf8] sm:$0xff]  ;;  %v207_v4 = vld [vmem:[%s944_s25 + $0xf0] sm:$0xff]  ;;  %v206_v8 = vld [vmem:[%s944_s25 + $0xe8] sm:$0xff]  ;;  %s535_s20 = sshll.u32 %s940_s14, 2  ;;  %s546_s23 = sshll.u32 %s841_s13, 6 }
  0x48   : > { %778 = vsyncadd (%p1078_p3), [#allocation6], 4294967168  ;;  %v240_v1 = vld [vmem:[%s944_s25 + $0x1f8] sm:$0xff]  ;;  %547 = vmatprep.subr.mxu0 %v208_v0  ;;  %v239_v5 = vld [vmem:[%s944_s25 + $0x1f0] sm:$0xff]  ;;  %s174_s28 = scalar_lea.vmem [#allocation7], %s535_s20  ;;  %s443_s26 = scalar_lea.hbm %s1062_s2, %s546_s23 }
  0x49   : > { %v192_v2 = vld [vmem:[%s944_s25 + $0x78] sm:$0xff]  ;;  %581 = vmatprep.subr.mxu1 %v240_v1  ;;  %v191_v6 = vld [vmem:[%s944_s25 + $0x70] sm:$0xff]  ;;  %v238_v9 = vld [vmem:[%s944_s25 + $0x1e8] sm:$0xff]  ;;  %v803_v1 = vmov 1966171168   ;;  %s445_s7 = sshll.u32 %s174_s28, 4  ;;  %s446_s7 = int_to_ptr.vmem [resolvable:$true] %s445_s7 }
  0x4a   : > { %v224_v3 = vld [vmem:[%s944_s25 + $0x178] sm:$0xff]  ;;  %548 = vmatpush3.xpose.msra.mxu0 %v192_v2  ;;  %v223_v7 = vld [vmem:[%s944_s25 + $0x170] sm:$0xff]  ;;  %v190_v10 = vld [vmem:[%s944_s25 + $0x68] sm:$0xff]  ;;  %v403_v2 = vunpack.c.l.s4 %v803_v1  ;;  %s431_s29 = scalar_lea.sflag [#allocation4], %s940_s14  ;;  %s729_s30 = scalar_lea.vmem %s446_s7, 64 }
  0x4b   : > { %582 = vmatpush3.xpose.msra.mxu1 %v224_v3  ;;  %549 = vmatprep.subr.mxu0 %v207_v4  ;;  %v222_v11 = vld [vmem:[%s944_s25 + $0x168] sm:$0xff]  ;;  %v205_v12 = vld [vmem:[%s944_s25 + $0xe0] sm:$0xff]  ;;  %v204_v16 = vld [vmem:[%s944_s25 + $0xd8] sm:$0xff]  ;;  %v405_v3 = vlaneseq  ;;  %p730_p12 = scmp.ne.s32.totalorder %s446_s7, %s729_s30  ;;  %p1079_p1 = scmp.ne.s32.totalorder %s1069_s21, 0 }
  0x4c   : > { %583 = vmatprep.subr.mxu1 %v239_v5  ;;  %v237_v13 = vld [vmem:[%s944_s25 + $0x1e0] sm:$0xff]  ;;  %v236_v17 = vld [vmem:[%s944_s25 + $0x1d8] sm:$0xff]  ;;  %v203_v20 = vld [vmem:[%s944_s25 + $0xd0] sm:$0xff]  ;;  %s804_s27 = smov [#allocation7]  }
  0x4d   : > { %v189_v14 = vld [vmem:[%s944_s25 + $0x60] sm:$0xff]  ;;  %v188_v18 = vld [vmem:[%s944_s25 + $0x58] sm:$0xff]  ;;  %v235_v21 = vld [vmem:[%s944_s25 + $0x1d0] sm:$0xff]  ;;  %vm427_vm0 = vcmp.lt.s32.totalorder %v405_v3, 512  ;;  %p731_p7 = pnand %p730_p12, %p1079_p1  ;;  %s733_s3 = sshll.u32 %s804_s27, 4  ;;  %s734_s3 = int_to_ptr.vmem [resolvable:$false] %s733_s3 }
  0x4e   : > { %550 = vmatpush3.xpose.msra.mxu0 %v191_v6  ;;  %v221_v15 = vld [vmem:[%s944_s25 + $0x160] sm:$0xff]  ;;  %v220_v19 = vld [vmem:[%s944_s25 + $0x158] sm:$0xff]  ;;  %v187_v22 = vld [vmem:[%s944_s25 + $0x50] sm:$0xff]  ;;  %v404_v6 = vunpack.c.0.s8 %v403_v2  ;;  %s735_s13 = scalar_lea.vmem %s734_s3, 128  ;;  %p736_p9 = scmp.lt.s32.totalorder %s446_s7, %s734_s3 }
  0x4f   : > { %584 = vmatpush3.xpose.msra.mxu1 %v223_v7  ;;  %551 = vmatprep.subr.mxu0 %v206_v8  ;;  %v219_v23 = vld [vmem:[%s944_s25 + $0x150] sm:$0xff]  ;;  %v202_v24 = vld [vmem:[%s944_s25 + $0xc8] sm:$0xff]  ;;  %v980_v26 = vld [vmem:[#allocation5] sm:$0xff]  ;;  %v406_v7 = vshrl.u32 %v405_v3, 7  ;;  %p732_p8 = pneg %p731_p7  ;;  %p737_p10 = scmp.lt.s32.totalorder %s735_s13, %s729_s30 }
  0x50   : > { %585 = vmatprep.subr.mxu1 %v238_v9  ;;  %v234_v25 = vld [vmem:[%s944_s25 + $0x1c8] sm:$0xff]  ;;  %v201_v29 = vld [vmem:[%s944_s25 + $0xc0] sm:$0xff]  ;;  %579 = vmatprep.mubr.f32.mxu0 %v980_v26  ;;  %v200_v33 = vld [vmem:[%s944_s25 + $0xb8] sm:$0xff] }
  0x51   : > { %v186_v27 = vld [vmem:[%s944_s25 + $0x48] sm:$0xff]  ;;  %v233_v30 = vld [vmem:[%s944_s25 + $0x1c0] sm:$0xff]  ;;  %613 = vmatprep.mubr.f32.mxu1 %v980_v26  ;;  %v232_v34 = vld [vmem:[%s944_s25 + $0x1b8] sm:$0xff]  ;;  %p738_p2 = por %p737_p10, %p736_p9 }
  0x52   : > { %552 = vmatpush3.xpose.msra.mxu0 %v190_v10  ;;  %v218_v28 = vld [vmem:[%s944_s25 + $0x148] sm:$0xff]  ;;  %v185_v31 = vld [vmem:[%s944_s25 + $0x40] sm:$0xff]  ;;  %v184_v35 = vld [vmem:[%s944_s25 + $0x38] sm:$0xff] }
  0x53   : > { %586 = vmatpush3.xpose.msra.mxu1 %v222_v11  ;;  %553 = vmatprep.subr.mxu0 %v205_v12  ;;  %v217_v32 = vld [vmem:[%s944_s25 + $0x140] sm:$0xff]  ;;  %v216_v36 = vld [vmem:[%s944_s25 + $0x138] sm:$0xff]  ;;  %v199_v37 = vld [vmem:[%s944_s25 + $0xb0] sm:$0xff]  ;;  %p739_p0 = pnand %p738_p2, %p732_p8 }
  0x54   : > { %587 = vmatprep.subr.mxu1 %v237_v13  ;;  %v231_v38 = vld [vmem:[%s944_s25 + $0x1b0] sm:$0xff]  ;;  %v198_v41 = vld [vmem:[%s944_s25 + $0xa8] sm:$0xff]  ;;  %v197_v45 = vld [vmem:[%s944_s25 + $0xa0] sm:$0xff] }
  0x55   : > { %v183_v39 = vld [vmem:[%s944_s25 + $0x30] sm:$0xff]  ;;  %v230_v42 = vld [vmem:[%s944_s25 + $0x1a8] sm:$0xff]  ;;  %v229_v46 = vld [vmem:[%s944_s25 + $0x1a0] sm:$0xff] }
  0x56   : > { %554 = vmatpush3.xpose.msra.mxu0 %v189_v14  ;;  %v215_v40 = vld [vmem:[%s944_s25 + $0x130] sm:$0xff]  ;;  %v182_v43 = vld [vmem:[%s944_s25 + $0x28] sm:$0xff]  ;;  %v181_v47 = vld [vmem:[%s944_s25 + $0x20] sm:$0xff]  ;;  %v407_v14 = vsub.s32 %v404_v6, %v406_v7 }
  0x57   : > { %588 = vmatpush3.xpose.msra.mxu1 %v221_v15  ;;  %555 = vmatprep.subr.mxu0 %v204_v16  ;;  %v214_v44 = vld [vmem:[%s944_s25 + $0x128] sm:$0xff]  ;;  %v213_v48 = vld [vmem:[%s944_s25 + $0x120] sm:$0xff]  ;;  %v196_v49 = vld [vmem:[%s944_s25 + $0x98] sm:$0xff] }
  0x58   : > { %589 = vmatprep.subr.mxu1 %v236_v17  ;;  %v228_v50 = vld [vmem:[%s944_s25 + $0x198] sm:$0xff]  ;;  %v195_v53 = vld [vmem:[%s944_s25 + $0x90] sm:$0xff]  ;;  %v194_v57 = vld [vmem:[%s944_s25 + $0x88] sm:$0xff] }
  0x59   : > { %v180_v51 = vld [vmem:[%s944_s25 + $0x18] sm:$0xff]  ;;  %v227_v54 = vld [vmem:[%s944_s25 + $0x190] sm:$0xff]  ;;  %v226_v58 = vld [vmem:[%s944_s25 + $0x188] sm:$0xff] }
  0x5a   : > { %556 = vmatpush3.xpose.msra.mxu0 %v188_v18  ;;  %v212_v52 = vld [vmem:[%s944_s25 + $0x118] sm:$0xff]  ;;  %v179_v55 = vld [vmem:[%s944_s25 + $0x10] sm:$0xff]  ;;  %v178_v59 = vld [vmem:[%s944_s25 + $0x8] sm:$0xff] }
  0x5b   : > { %590 = vmatpush3.xpose.msra.mxu1 %v220_v19  ;;  %557 = vmatprep.subr.mxu0 %v203_v20  ;;  %v211_v56 = vld [vmem:[%s944_s25 + $0x110] sm:$0xff]  ;;  %v210_v60 = vld [vmem:[%s944_s25 + $0x108] sm:$0xff]  ;;  %v193_v61 = vld [vmem:[%s944_s25 + $0x80] sm:$0xff] }
  0x5c   : > { %591 = vmatprep.subr.mxu1 %v235_v21  ;;  %v225_v62 = vld [vmem:[%s944_s25 + $0x180] sm:$0xff] }
  0x5d   : > { %v177_v63 = vld [vmem:[%s944_s25] sm:$0xff] }
  0x5e   : > { %558 = vmatpush3.xpose.msra.mxu0 %v187_v22  ;;  %v209_v0 = vld [vmem:[%s944_s25 + $0x100] sm:$0xff] }
  0x5f   : > { %592 = vmatpush3.xpose.msra.mxu1 %v219_v23  ;;  %559 = vmatprep.subr.mxu0 %v202_v24 }
  0x60   : > { %593 = vmatprep.subr.mxu1 %v234_v25 }
  0x62   : > { %560 = vmatpush3.xpose.msra.mxu0 %v186_v27 }
  0x63   : > { %594 = vmatpush3.xpose.msra.mxu1 %v218_v28  ;;  %561 = vmatprep.subr.mxu0 %v201_v29 }
  0x64   : > { %595 = vmatprep.subr.mxu1 %v233_v30 }
  0x66   : > { %562 = vmatpush3.xpose.msra.mxu0 %v185_v31 }
  0x67   : > { %596 = vmatpush3.xpose.msra.mxu1 %v217_v32  ;;  %563 = vmatprep.subr.mxu0 %v200_v33 }
  0x68   : > { %597 = vmatprep.subr.mxu1 %v232_v34 }
  0x6a   : > { %564 = vmatpush3.xpose.msra.mxu0 %v184_v35 }
  0x6b   : > { %598 = vmatpush3.xpose.msra.mxu1 %v216_v36  ;;  %565 = vmatprep.subr.mxu0 %v199_v37 }
  0x6c   : > { %599 = vmatprep.subr.mxu1 %v231_v38 }
  0x6e   : > { %566 = vmatpush3.xpose.msra.mxu0 %v183_v39 }
  0x6f   : > { %600 = vmatpush3.xpose.msra.mxu1 %v215_v40  ;;  %567 = vmatprep.subr.mxu0 %v198_v41 }
  0x70   : > { %601 = vmatprep.subr.mxu1 %v230_v42 }
  0x72   : > { %568 = vmatpush3.xpose.msra.mxu0 %v182_v43 }
  0x73   : > { %602 = vmatpush3.xpose.msra.mxu1 %v214_v44  ;;  %569 = vmatprep.subr.mxu0 %v197_v45 }
  0x74   : > { %603 = vmatprep.subr.mxu1 %v229_v46 }
  0x76   : > { %570 = vmatpush3.xpose.msra.mxu0 %v181_v47 }
  0x77   : > { %604 = vmatpush3.xpose.msra.mxu1 %v213_v48  ;;  %571 = vmatprep.subr.mxu0 %v196_v49 }
  0x78   : > { %605 = vmatprep.subr.mxu1 %v228_v50 }
  0x7a   : > { %572 = vmatpush3.xpose.msra.mxu0 %v180_v51 }
  0x7b   : > { %606 = vmatpush3.xpose.msra.mxu1 %v212_v52  ;;  %573 = vmatprep.subr.mxu0 %v195_v53 }
  0x7c   : > { %607 = vmatprep.subr.mxu1 %v227_v54 }
  0x7e   : > { %574 = vmatpush3.xpose.msra.mxu0 %v179_v55 }
  0x7f   : > { %608 = vmatpush3.xpose.msra.mxu1 %v211_v56  ;;  %575 = vmatprep.subr.mxu0 %v194_v57 }
  0x80   : > { %609 = vmatprep.subr.mxu1 %v226_v58 }
  0x82   : > { %576 = vmatpush3.xpose.msra.mxu0 %v178_v59 }
  0x83   : > { %610 = vmatpush3.xpose.msra.mxu1 %v210_v60  ;;  %577 = vmatprep.subr.mxu0 %v193_v61 }
  0x84   : > { %611 = vmatprep.subr.mxu1 %v225_v62 }
  0x86   : > { %578 = vmatpush3.xpose.msra.mxu0 %v177_v63 }
  0x87   : > { %612 = vmatpush3.xpose.msra.mxu1 %v209_v0 }
  0x89   : > { %580 = vmatmul.mubr.f32.vlgmr.msra.gmra.mxu0 %v980_v26 }
  0x8a   : > { %614 = vmatmul.mubr.f32.vlgmr.msra.gmra.mxu1 %v980_v26 }
 0x149   : > { %v308_v4 = vpop.f32.mrf.mxu0 }
 0x14a   : > { %v379_v5 = vpop.f32.mrf.mxu1  ;;  %v384_v8 = vmul.f32 0.5, %v308_v4 }
 0x14b   : > { %v386_v9 = vmul.f32 0.5, %v379_v5  ;;  %v310_v10 = vpop.f32.mrf.mxu0 }
 0x14c   : > { %v381_v11 = vpop.f32.mrf.mxu1  ;;  %v385_v12 = vmul.f32 0.5, %v310_v10  ;;  %v536_v15 = vclamps-f32 %v384_v8, 6.0 }
 0x14d   : > { %v387_v13 = vmul.f32 0.5, %v381_v11  ;;  %v538_v16 = vclamps-f32 %v386_v9, 6.0 }
 0x14e   : > { %v537_v17 = vclamps-f32 %v385_v12, 6.0 }
 0x14f   : > { %v539_v18 = vclamps-f32 %v387_v13, 6.0 }
 0x150   : > { %v400_v19 = vcombine.low %v536_v15, %v537_v17 }
 0x151   : > { %v401_v20 = vcombine.low %v538_v16, %v539_v18 }
 0x152   : > { %v408_v21 = vrot.slane %v400_v19, %v407_v14 }
 0x153   : > { %v415_v22 = vrot.slane %v401_v20, %v407_v14 }
 0x155   : > { %v416_v23 = vcombine.low %v408_v21, %v415_v22 }
 0x157   : > { %v423_v24 = vrot.slane %v416_v23, %v407_v14 }
 0x159   : > { %429 = vst.msk [vmem:[%s174_s28] sm:$0xf] %vm427_vm0, %v423_v24 }
 0x15a   : > { %742 = shalt.err (!%p739_p0)
}
 0x15b   : > { %s743_s4 = scalar_lea.hbm %s443_s26, 64  ;;  %s747_s8 = scalar_lea.hbm %s1062_s2, 128 }
 0x15c   : > { %p744_p4 = scmp.ne.s32.totalorder %s443_s26, %s743_s4  ;;  %p748_p6 = scmp.lt.s32.totalorder %s443_s26, %s1062_s2 }
 0x15d   : > { %p749_p13 = scmp.lt.s32.totalorder %s747_s8, %s743_s4 }
 0x15e   : > { %p745_p11 = pnand %p744_p4, %p1079_p1 }
 0x15f   : > { %p750_p3 = por %p749_p13, %p748_p6 }
 0x160   : > { %p746_p5 = pneg %p745_p11 }
 0x162   : > { %p751_p12 = pnand %p750_p3, %p746_p5 }
 0x164   : > { %754 = shalt.err (!%p751_p12)
}
 0x165   : > { %621 = dma.vmem_to_hbm [thread:$0]  (%p1079_p1), %s446_s7, 64, %s443_s26, %s431_s29  }
 0x166 PF: > { %s457_s24 = sand.u32 1, %s785_s9   ;;  %p1080_p7 = scmp.ne.s32.totalorder %s1070_s22, 0 }
 0x167   : > { %p1081_p8 = scmp.ge.s32.totalorder %s797_s12, 2  ;;  %s458_s25 = scalar_lea.sflag [#allocation4], %s457_s24 }
 0x169   : > { %p632_p9 = pnand %p1081_p8, %p1080_p7 }
 0x16b   : > { %p633_p10 = pneg %p632_p9 }
 0x16d   : > { %780 = dma.done.wait (%p633_p10), %s458_s25, 64  }
 0x16e   : > { %782 = vsyncadd (%p633_p10), %s458_s25, 4294967232  ;;  %p16_p2 = scmp.ge.s32.totalorder %s845_s15, 4   ;;  %s1082_s9 = smov %s789_s10 }
 0x16f   : > { %s1083_s10 = smov %s793_s11  ;;  %s1084_s11 = smov %s857_s18 }
 0x170   : > { %s1085_s12 = smov %s845_s15  ;;  %18 = sbr.rel (!%p16_p2) target bundleno = 6 (0x6), region = 77 }
 0x175   :  { %463 = vsyncpa [#allocation3], 1 }
 0x176   :  { %465 = vsyncpa [#allocation3 + $0x1], 1 }
 0x177   :  { %466 = vsyncpa [#allocation6], 1 }
 0x178   :  { %467 = vsyncpa [#allocation4], 1 }
 0x179   :  { %469 = vsyncpa [#allocation4 + $0x1], 1 }

</bundles_post_ra>
